<compile_context>
chip_gen: v5e
topology: v5e:2x2
jax: 0.10.0
libtpu: 0.0.40
codegen_flags: <defaults>
</compile_context>

<pallas_src>
import functools

import jax
import jax.numpy as jnp
from jax.experimental import pallas as pl
from jax.experimental.pallas import tpu as pltpu


def _round_up(x: int, m: int) -> int:
    return ((x + m - 1) // m) * m


# ---------------------------------------------------------------------------
# Kernel A: resident weights, layer loop unrolled inside the kernel.
#   grid = (batch_tiles,)
# ---------------------------------------------------------------------------
def _mlp_resident_kernel(x_ref, w_ref, b_ref, o_ref, *, num_layers):
    """x_ref: [tm, D]  w_ref: [L, D, D]  b_ref: [L, 1, D]  o_ref: [tm, D]."""
    y = x_ref[...].astype(jnp.float32)
    for l in range(num_layers):                    # static -> fully unrolled
        y = jnp.dot(y.astype(w_ref.dtype), w_ref[l],
                    preferred_element_type=jnp.float32)
        y = y + b_ref[l].astype(jnp.float32)       # [1, D] broadcasts
        if l < num_layers - 1:
            y = jnp.maximum(y, 0.0)
    o_ref[...] = y.astype(o_ref.dtype)


# ---------------------------------------------------------------------------
# Kernel B (fallback for very large stacks): one layer per grid step, the
# activation stays resident in a VMEM scratch across the layer axis.
#   grid = (batch_tiles, num_layers)
# ---------------------------------------------------------------------------
def _mlp_streamed_kernel(x_ref, w_ref, b_ref, o_ref, y_scr):
    l = pl.program_id(1)
    num_layers = pl.num_programs(1)
    is_last = l == num_layers - 1

    @pl.when(l == 0)
    def _():
        y_scr[...] = x_ref[...].astype(jnp.float32)

    y = jnp.dot(y_scr[...].astype(w_ref.dtype), w_ref[0],
                preferred_element_type=jnp.float32)
    y = y + b_ref[0].astype(jnp.float32)

    @pl.when(jnp.logical_not(is_last))
    def _():
        y_scr[...] = jnp.maximum(y, 0.0)

    @pl.when(is_last)
    def _():
        o_ref[...] = y.astype(o_ref.dtype)


# ---------------------------------------------------------------------------
# Host-side glue
# ---------------------------------------------------------------------------
def prepare_mlp_params(params, *, compute_dtype=jnp.float32):
    """Pad / transpose / stack weights ONCE (hoisted off the forward path).

    params: list of (W [out, in], b [out]) per nn.Linear layer.
    """
    in_dim = params[0][0].shape[1]
    out_dim = params[-1][0].shape[0]
    widths = [in_dim] + [W.shape[0] for W, _ in params]
    D = _round_up(max(widths), 128)           # lane-dense MXU / unmasked stores
    L = len(params)

    # Weights pre-transposed to [in, out], zero-padded to [D, D]; zero padding
    # is exact (padded input cols hit zero weight rows, padded output cols get
    # zero bias, so they stay 0 through ReLU).
    w_stack = jnp.stack([
        jnp.pad(W.T.astype(compute_dtype),
                ((0, D - W.shape[1]), (0, D - W.shape[0])))
        for W, _ in params
    ])                                        # [L, D, D]
    b_stack = jnp.stack([
        jnp.pad(b.astype(jnp.float32), (0, D - b.shape[0])).reshape(1, D)
        for _, b in params
    ])                                        # [L, 1, D]

    return dict(w=w_stack, b=b_stack, in_dim=in_dim, out_dim=out_dim,
                D=D, L=L, compute_dtype=compute_dtype)


def mlp_forward_pallas(x, prepared, *, max_tile=512,
                       resident_weight_limit_bytes=32 << 20):
    """Fused MLP forward.  x: [..., widths[0]] with >= 1 batch dim."""
    assert x.ndim >= 2, "Must be batched."
    in_dim = prepared["in_dim"]
    out_dim = prepared["out_dim"]
    D = prepared["D"]
    L = prepared["L"]
    compute_dtype = prepared["compute_dtype"]
    w_stack = prepared["w"]
    b_stack = prepared["b"]
    assert x.shape[-1] == in_dim, "Last dim must match widths[0]."

    batch_shape = x.shape[:-1]
    x2 = x.reshape(-1, in_dim)
    M = x2.shape[0]

    itemsize = jnp.dtype(compute_dtype).itemsize
    sublane = 16 if itemsize == 2 else 8      # sub-32-bit dtypes pack 2x sublanes
    tm = min(max_tile, _round_up(M, sublane))
    M_pad = _round_up(M, tm)
    n_tiles = M_pad // tm

    x_pad = jnp.zeros((M_pad, D), compute_dtype).at[:M, :in_dim].set(
        x2.astype(compute_dtype))

    weight_bytes = L * D * D * itemsize
    bias_bytes = L * D * 4
    out_itemsize = jnp.dtype(x.dtype).itemsize

    flops = 2 * M_pad * D * D * L
    bytes_accessed = (M_pad * D * itemsize + weight_bytes + bias_bytes
                      + M_pad * D * out_itemsize)
    cost = pl.CostEstimate(flops=int(flops), transcendentals=0,
                           bytes_accessed=int(bytes_accessed))

    if weight_bytes <= resident_weight_limit_bytes:
        # ---- resident-weight path: weights DMA'd once, layers unrolled ----
        needed = (weight_bytes + bias_bytes
                  + 2 * tm * D * itemsize          # double-buffered x tiles
                  + 2 * tm * D * out_itemsize      # double-buffered out tiles
                  + (2 << 20))                     # headroom
        vmem_limit = int(min(max(needed, 32 << 20), 64 << 20))  # v7x-safe cap

        out_padded = pl.pallas_call(
            functools.partial(_mlp_resident_kernel, num_layers=L),
            out_shape=jax.ShapeDtypeStruct((M_pad, D), x.dtype),
            grid_spec=pltpu.PrefetchScalarGridSpec(
                num_scalar_prefetch=0,
                grid=(n_tiles,),
                in_specs=[
                    pl.BlockSpec((tm, D), lambda i: (i, 0)),        # x tile
                    pl.BlockSpec((L, D, D), lambda i: (0, 0, 0)),   # resident W
                    pl.BlockSpec((L, 1, D), lambda i: (0, 0, 0)),   # resident b
                ],
                out_specs=pl.BlockSpec((tm, D), lambda i: (i, 0)),
            ),
            compiler_params=pltpu.CompilerParams(
                dimension_semantics=("parallel",),
                vmem_limit_bytes=vmem_limit),
            cost_estimate=cost,
        )(x_pad, w_stack, b_stack)
    else:
        # ---- fallback: stream one layer per grid step (huge weight stacks) ----
        out_padded = pl.pallas_call(
            _mlp_streamed_kernel,
            out_shape=jax.ShapeDtypeStruct((M_pad, D), x.dtype),
            grid_spec=pltpu.PrefetchScalarGridSpec(
                num_scalar_prefetch=0,
                grid=(n_tiles, L),
                in_specs=[
                    pl.BlockSpec((tm, D), lambda i, l: (i, 0)),
                    pl.BlockSpec((1, D, D), lambda i, l: (l, 0, 0)),
                    pl.BlockSpec((1, 1, D), lambda i, l: (l, 0, 0)),
                ],
                out_specs=pl.BlockSpec((tm, D), lambda i, l: (i, 0)),
                scratch_shapes=[pltpu.VMEM((tm, D), jnp.float32)],
            ),
            compiler_params=pltpu.CompilerParams(
                dimension_semantics=("parallel", "arbitrary")),
            cost_estimate=cost,
        )(x_pad, w_stack, b_stack)

    out = out_padded[:M, :out_dim]
    return out.reshape(*batch_shape, out_dim)


def init_mlp_params(widths, key):
    """Deterministic params for nn.Linear(w1, w2) layers: W [out, in], b [out]."""
    params = []
    for w1, w2 in zip(widths[:-1], widths[1:]):
        key, kw, kb = jax.random.split(key, 3)
        bound = 1.0 / (w1 ** 0.5)            # mimic PyTorch Linear init scale
        W = jax.random.uniform(kw, (w2, w1), jnp.float32, -bound, bound)
        b = jax.random.uniform(kb, (w2,), jnp.float32, -bound, bound)
        params.append((W, b))
    return params


def mlp_forward_ref(x, params):
    """Pure-JAX reference matching the PyTorch MLP forward exactly."""
    y = x
    for i, (W, b) in enumerate(params):
        y = y @ W.T + b
        if i < len(params) - 1:
            y = jnp.maximum(y, 0.0)
    return y


if __name__ == "__main__":
    widths = [16, 32, 32, 8]
    batch = 4

    key = jax.random.PRNGKey(0)
    key, kx = jax.random.split(key)
    x = jax.random.normal(kx, (batch, widths[0]), dtype=jnp.float32)
    params = init_mlp_params(widths, key)

    prepared = prepare_mlp_params(params)    # hoisted: build weight stacks once
    out = mlp_forward_pallas(x, prepared)
    out = jax.block_until_ready(out)

    ref = mlp_forward_ref(x, params)
    assert out.shape == (batch, widths[-1])
    assert jnp.allclose(out, ref, atol=1e-3, rtol=1e-3), "mismatch vs JAX reference"

    print("KERNEL_OK")
</pallas_src>

<mosaic_0001>
module attributes {stable_mosaic.version = 11 : i64} {
  func.func @_mlp_resident_kernel(%arg0: i32, %arg1: memref<8x128xf32, #tpu.memory_space<vmem>>, %arg2: memref<3x128x128xf32, #tpu.memory_space<vmem>>, %arg3: memref<3x1x128xf32, #tpu.memory_space<vmem>>, %arg4: memref<8x128xf32, #tpu.memory_space<vmem>>) attributes {dimension_semantics = [#tpu.dimension_semantics<parallel>], iteration_bounds = array<i64: 1>, scalar_prefetch = 0 : i64, scratch_operands = 0 : i64, tpu.core_type = #tpu.core_type<tc>, window_params = [{transform_indices = @transform_0, window_bounds = array<i64: 8, 128>}, {pipeline_mode = #tpu.pipeline_mode<synchronous>, transform_indices = @transform_1, window_bounds = array<i64: 3, 128, 128>}, {pipeline_mode = #tpu.pipeline_mode<synchronous>, transform_indices = @transform_2, window_bounds = array<i64: 3, 1, 128>}, {transform_indices = @transform_3, window_bounds = array<i64: 8, 128>}]} {
    %c0 = arith.constant 0 : index
    %c0_0 = arith.constant 0 : index
    %0 = vector.load %arg1[%c0, %c0_0] : memref<8x128xf32, #tpu.memory_space<vmem>>, vector<8x128xf32>
    %c0_1 = arith.constant 0 : index
    %c0_2 = arith.constant 0 : index
    %c0_3 = arith.constant 0 : index
    %1 = vector.load %arg2[%c0_1, %c0_2, %c0_3] : memref<3x128x128xf32, #tpu.memory_space<vmem>>, vector<1x128x128xf32>
    %2 = vector.shape_cast %1 : vector<1x128x128xf32> to vector<128x128xf32>
    %cst = arith.constant dense<0.000000e+00> : vector<8x128xf32>
    %3 = tpu.matmul %0, %2, %cst {dimension_numbers = #tpu.dot_dimension_numbers<[1], [0], [0], [1], [0, 0, 1, 1], [], []>} : vector<8x128xf32>, vector<128x128xf32>, vector<8x128xf32> -> vector<8x128xf32>
    %c0_4 = arith.constant 0 : index
    %c0_5 = arith.constant 0 : index
    %c0_6 = arith.constant 0 : index
    %4 = vector.load %arg3[%c0_4, %c0_5, %c0_6] : memref<3x1x128xf32, #tpu.memory_space<vmem>>, vector<1x1x128xf32>
    %5 = vector.shape_cast %4 : vector<1x1x128xf32> to vector<1x128xf32>
    %6 = vector.broadcast %5 : vector<1x128xf32> to vector<8x128xf32>
    %7 = arith.addf %3, %6 : vector<8x128xf32>
    %cst_7 = arith.constant 0.000000e+00 : f32
    %8 = vector.broadcast %cst_7 : f32 to vector<8x128xf32>
    %9 = arith.maximumf %7, %8 : vector<8x128xf32>
    %c1 = arith.constant 1 : index
    %c0_8 = arith.constant 0 : index
    %c0_9 = arith.constant 0 : index
    %10 = vector.load %arg2[%c1, %c0_8, %c0_9] : memref<3x128x128xf32, #tpu.memory_space<vmem>>, vector<1x128x128xf32>
    %11 = vector.shape_cast %10 : vector<1x128x128xf32> to vector<128x128xf32>
    %cst_10 = arith.constant dense<0.000000e+00> : vector<8x128xf32>
    %12 = tpu.matmul %9, %11, %cst_10 {dimension_numbers = #tpu.dot_dimension_numbers<[1], [0], [0], [1], [0, 0, 1, 1], [], []>} : vector<8x128xf32>, vector<128x128xf32>, vector<8x128xf32> -> vector<8x128xf32>
    %c1_11 = arith.constant 1 : index
    %c0_12 = arith.constant 0 : index
    %c0_13 = arith.constant 0 : index
    %13 = vector.load %arg3[%c1_11, %c0_12, %c0_13] : memref<3x1x128xf32, #tpu.memory_space<vmem>>, vector<1x1x128xf32>
    %14 = vector.shape_cast %13 : vector<1x1x128xf32> to vector<1x128xf32>
    %15 = vector.broadcast %14 : vector<1x128xf32> to vector<8x128xf32>
    %16 = arith.addf %12, %15 : vector<8x128xf32>
    %cst_14 = arith.constant 0.000000e+00 : f32
    %17 = vector.broadcast %cst_14 : f32 to vector<8x128xf32>
    %18 = arith.maximumf %16, %17 : vector<8x128xf32>
    %c2 = arith.constant 2 : index
    %c0_15 = arith.constant 0 : index
    %c0_16 = arith.constant 0 : index
    %19 = vector.load %arg2[%c2, %c0_15, %c0_16] : memref<3x128x128xf32, #tpu.memory_space<vmem>>, vector<1x128x128xf32>
    %20 = vector.shape_cast %19 : vector<1x128x128xf32> to vector<128x128xf32>
    %cst_17 = arith.constant dense<0.000000e+00> : vector<8x128xf32>
    %21 = tpu.matmul %18, %20, %cst_17 {dimension_numbers = #tpu.dot_dimension_numbers<[1], [0], [0], [1], [0, 0, 1, 1], [], []>} : vector<8x128xf32>, vector<128x128xf32>, vector<8x128xf32> -> vector<8x128xf32>
    %c2_18 = arith.constant 2 : index
    %c0_19 = arith.constant 0 : index
    %c0_20 = arith.constant 0 : index
    %22 = vector.load %arg3[%c2_18, %c0_19, %c0_20] : memref<3x1x128xf32, #tpu.memory_space<vmem>>, vector<1x1x128xf32>
    %23 = vector.shape_cast %22 : vector<1x1x128xf32> to vector<1x128xf32>
    %24 = vector.broadcast %23 : vector<1x128xf32> to vector<8x128xf32>
    %25 = arith.addf %21, %24 : vector<8x128xf32>
    %c0_21 = arith.constant 0 : index
    %c0_22 = arith.constant 0 : index
    %26 = vector.load %arg4[%c0_21, %c0_22] : memref<8x128xf32, #tpu.memory_space<vmem>>, vector<8x128xf32>
    tpu.vector_store %arg4[%c0_21, %c0_22], %25 {strides = array<i32>} : memref<8x128xf32, #tpu.memory_space<vmem>>, vector<8x128xf32>,
    return
  }
  func.func @transform_0(%arg0: i32) -> (i32, i32) {
    %c0_i32 = arith.constant 0 : i32
    %c0_i32_0 = arith.constant 0 : i32
    return %arg0, %c0_i32 : i32, i32
  }
  func.func @transform_1(%arg0: i32) -> (i32, i32, i32) {
    %c0_i32 = arith.constant 0 : i32
    %c0_i32_0 = arith.constant 0 : i32
    %c0_i32_1 = arith.constant 0 : i32
    %c0_i32_2 = arith.constant 0 : i32
    return %c0_i32, %c0_i32_0, %c0_i32_1 : i32, i32, i32
  }
  func.func @transform_2(%arg0: i32) -> (i32, i32, i32) {
    %c0_i32 = arith.constant 0 : i32
    %c0_i32_0 = arith.constant 0 : i32
    %c0_i32_1 = arith.constant 0 : i32
    %c0_i32_2 = arith.constant 0 : i32
    return %c0_i32, %c0_i32_0, %c0_i32_1 : i32, i32, i32
  }
  func.func @transform_3(%arg0: i32) -> (i32, i32) {
    %c0_i32 = arith.constant 0 : i32
    %c0_i32_0 = arith.constant 0 : i32
    return %arg0, %c0_i32 : i32, i32
  }
}

</mosaic_0001>

<bundles_post_ra>
// kernel: tpu_custom_call.1
= control target key start
LH: loop header
LB: loop body
LE: loop exit
PB: predicated region body
PF: predicated region fallthrough
CT: control target
= control target key end

     0   :  { %8 = vsyncpa [#allocation3], 0  ;;  %s359_s0 = inlined_call_operand.hbm [shape: f32[8,128], index: 0, kind: input, shape index: {}]   ;;  %s360_s1 = inlined_call_operand.hbm [shape: f32[3,128,128], index: 1, kind: input, shape index: {}]   ;;  %s361_s2 = inlined_call_operand.hbm [shape: f32[3,1,128], index: 2, kind: input, shape index: {}]   ;;  %s362_s3 = inlined_call_operand.hbm [shape: f32[8,128], index: 3, kind: output, shape index: {}]  }
   0x1   :  { %9 = vsyncpa [#allocation6], 0  ;;  %s26_s14 = sshll.u32 %s360_s1, 4  ;;  %s27_s14 = int_to_ptr.hbm [resolvable:$true] %s26_s14 }
   0x2   :  { %10 = vsyncpa [#allocation4], 0  ;;  %s319_s15 = smov [#allocation5]   ;;  %s16_s19 = sshll.u32 %s359_s0, 4  ;;  %s17_s19 = int_to_ptr.hbm [resolvable:$true] %s16_s19 }
   0x3   :  { %s28_s16 = sshll.u32 %s319_s15, 4  ;;  %s320_s20 = smov 128   ;;  %s29_s16 = int_to_ptr.vmem [resolvable:$true] %s28_s16 }
   0x4   :  { %s321_s21 = smov 8   ;;  %s322_s22 = smov [#allocation2]  }
   0x5   :  { %34 = dma.hbm_to_vmem [thread:$0]  %s27_s14, 6144, %s29_s16, [#allocation6], %s320_s20, %s320_s20, %s321_s21  }
   0x6   :  { %s18_s23 = sshll.u32 %s322_s22, 4  ;;  %s39_s26 = sshll.u32 %s361_s2, 4  ;;  %s19_s23 = int_to_ptr.vmem [resolvable:$true] %s18_s23  ;;  %s40_s26 = int_to_ptr.hbm [resolvable:$true] %s39_s26 }
   0x7   :  { %21 = dma.hbm_to_vmem [thread:$0]  %s17_s19, 128, %s19_s23, [#allocation3]  }
   0x8   :  { %s323_s1 = smov [#allocation7]   ;;  %s324_s28 = smov 16  }
   0x9   :  { %s41_s27 = sshll.u32 %s323_s1, 4  ;;  %s325_s29 = smov 1   ;;  %s42_s27 = int_to_ptr.vmem [resolvable:$true] %s41_s27 }
   0xa   :  { %47 = dma.hbm_to_vmem [thread:$0]  %s40_s26, 48, %s42_s27, [#allocation6], %s324_s28, %s324_s28, %s325_s29  }
   0xb   :  { %313 = dma.done.wait [#allocation3], 128  }
   0xc   :  { %314 = vsyncadd [#allocation3], 4294967168 }
   0xd   :  { %315 = dma.done.wait [#allocation6], 6192  }
   0xe   :  { %316 = vsyncadd [#allocation6], 4294961104  ;;  %v76_v0 = vld [vmem:[#allocation5 + $0x78] sm:$0xff]  ;;  %v75_v1 = vld [vmem:[#allocation5 + $0x70] sm:$0xff]  ;;  %s326_s0 = smov [#allocation8]   ;;  %s195_s5 = sshll.u32 %s362_s3, 4  ;;  %s196_s5 = int_to_ptr.hbm [resolvable:$true] %s195_s5 }
   0xf   :  { %81 = vmatpush.msra.mxu0 %v76_v0  ;;  %v74_v2 = vld [vmem:[#allocation5 + $0x68] sm:$0xff]  ;;  %v73_v3 = vld [vmem:[#allocation5 + $0x60] sm:$0xff]  ;;  %v118_v4 = vld [vmem:[#allocation5 + $0xf8] sm:$0xff]  ;;  %s193_s2 = sshll.u32 %s326_s0, 4  ;;  %s194_s2 = int_to_ptr.vmem [resolvable:$true] %s193_s2 }
  0x10   :  { %v72_v5 = vld [vmem:[#allocation5 + $0x58] sm:$0xff]  ;;  %124 = vmatpush.msra.mxu1 %v118_v4  ;;  %v117_v6 = vld [vmem:[#allocation5 + $0xf0] sm:$0xff]  ;;  %v116_v7 = vld [vmem:[#allocation5 + $0xe8] sm:$0xff] }
  0x11   :  { %82 = vmatpush.msra.mxu0 %v75_v1  ;;  %v71_v8 = vld [vmem:[#allocation5 + $0x50] sm:$0xff]  ;;  %v115_v9 = vld [vmem:[#allocation5 + $0xe0] sm:$0xff]  ;;  %v70_v10 = vld [vmem:[#allocation5 + $0x48] sm:$0xff] }
  0x12   :  { %125 = vmatpush.msra.mxu1 %v117_v6  ;;  %v114_v11 = vld [vmem:[#allocation5 + $0xd8] sm:$0xff]  ;;  %v69_v12 = vld [vmem:[#allocation5 + $0x40] sm:$0xff]  ;;  %v113_v13 = vld [vmem:[#allocation5 + $0xd0] sm:$0xff] }
  0x13   :  { %83 = vmatpush.msra.mxu0 %v74_v2  ;;  %v68_v14 = vld [vmem:[#allocation5 + $0x38] sm:$0xff]  ;;  %v112_v15 = vld [vmem:[#allocation5 + $0xc8] sm:$0xff]  ;;  %v67_v16 = vld [vmem:[#allocation5 + $0x30] sm:$0xff] }
  0x14   :  { %126 = vmatpush.msra.mxu1 %v116_v7  ;;  %v111_v17 = vld [vmem:[#allocation5 + $0xc0] sm:$0xff]  ;;  %v66_v18 = vld [vmem:[#allocation5 + $0x28] sm:$0xff]  ;;  %v110_v19 = vld [vmem:[#allocation5 + $0xb8] sm:$0xff] }
  0x15   :  { %84 = vmatpush.msra.mxu0 %v73_v3  ;;  %v65_v20 = vld [vmem:[#allocation5 + $0x20] sm:$0xff]  ;;  %v109_v21 = vld [vmem:[#allocation5 + $0xb0] sm:$0xff]  ;;  %v64_v22 = vld [vmem:[#allocation5 + $0x18] sm:$0xff] }
  0x16   :  { %127 = vmatpush.msra.mxu1 %v115_v9  ;;  %v108_v23 = vld [vmem:[#allocation5 + $0xa8] sm:$0xff]  ;;  %v63_v24 = vld [vmem:[#allocation5 + $0x10] sm:$0xff]  ;;  %v107_v25 = vld [vmem:[#allocation5 + $0xa0] sm:$0xff] }
  0x17   :  { %85 = vmatpush.msra.mxu0 %v72_v5  ;;  %v62_v26 = vld [vmem:[#allocation5 + $0x8] sm:$0xff]  ;;  %v106_v27 = vld [vmem:[#allocation5 + $0x98] sm:$0xff]  ;;  %v61_v28 = vld [vmem:[#allocation5] sm:$0xff] }
  0x18   :  { %128 = vmatpush.msra.mxu1 %v114_v11  ;;  %v60_v29 = vld [vmem:[#allocation2] sm:$0xff]  ;;  %v105_v30 = vld [vmem:[#allocation5 + $0x90] sm:$0xff]  ;;  %v104_v31 = vld [vmem:[#allocation5 + $0x88] sm:$0xff] }
  0x19   :  { %86 = vmatpush.msra.mxu0 %v71_v8  ;;  %v103_v32 = vld [vmem:[#allocation5 + $0x80] sm:$0xff]  ;;  %v161_v33 = vld [vmem:[#allocation5 + $0x178] sm:$0xff]  ;;  %v160_v34 = vld [vmem:[#allocation5 + $0x170] sm:$0xff] }
  0x1a   :  { %129 = vmatpush.msra.mxu1 %v113_v13  ;;  %167 = vmatpush.msra.mxu2 %v161_v33  ;;  %v159_v35 = vld [vmem:[#allocation5 + $0x168] sm:$0xff]  ;;  %v158_v36 = vld [vmem:[#allocation5 + $0x160] sm:$0xff]  ;;  %v157_v37 = vld [vmem:[#allocation5 + $0x158] sm:$0xff] }
  0x1b   :  { %87 = vmatpush.msra.mxu0 %v70_v10  ;;  %v156_v38 = vld [vmem:[#allocation5 + $0x150] sm:$0xff]  ;;  %v155_v39 = vld [vmem:[#allocation5 + $0x148] sm:$0xff]  ;;  %v154_v40 = vld [vmem:[#allocation5 + $0x140] sm:$0xff] }
  0x1c   :  { %130 = vmatpush.msra.mxu1 %v112_v15  ;;  %168 = vmatpush.msra.mxu2 %v160_v34  ;;  %v153_v41 = vld [vmem:[#allocation5 + $0x138] sm:$0xff]  ;;  %v152_v42 = vld [vmem:[#allocation5 + $0x130] sm:$0xff]  ;;  %v151_v43 = vld [vmem:[#allocation5 + $0x128] sm:$0xff] }
  0x1d   :  { %88 = vmatpush.msra.mxu0 %v69_v12  ;;  %v150_v44 = vld [vmem:[#allocation5 + $0x120] sm:$0xff]  ;;  %v149_v45 = vld [vmem:[#allocation5 + $0x118] sm:$0xff]  ;;  %v148_v50 = vld [vmem:[#allocation5 + $0x110] sm:$0xff] }
  0x1e   :  { %131 = vmatpush.msra.mxu1 %v111_v17  ;;  %169 = vmatpush.msra.mxu2 %v159_v35  ;;  %v214_v46 = vld [vmem:[#allocation7] ss:$0 sm:$0xff]  ;;  %v147_v51 = vld [vmem:[#allocation5 + $0x108] sm:$0xff]  ;;  %v215_v53 = vld [vmem:[#allocation7 + $0x1] ss:$0 sm:$0xff] }
  0x1f   :  { %89 = vmatpush.msra.mxu0 %v68_v14  ;;  %v146_v52 = vld [vmem:[#allocation5 + $0x100] sm:$0xff] }
  0x20   :  { %132 = vmatpush.msra.mxu1 %v110_v19  ;;  %170 = vmatpush.msra.mxu2 %v158_v36  ;;  %v216_v57 = vld [vmem:[#allocation7 + $0x2] ss:$0 sm:$0xff] }
  0x21   :  { %90 = vmatpush.msra.mxu0 %v67_v16 }
  0x22   :  { %133 = vmatpush.msra.mxu1 %v109_v21  ;;  %171 = vmatpush.msra.mxu2 %v157_v37 }
  0x23   :  { %91 = vmatpush.msra.mxu0 %v66_v18 }
  0x24   :  { %134 = vmatpush.msra.mxu1 %v108_v23  ;;  %172 = vmatpush.msra.mxu2 %v156_v38 }
  0x25   :  { %92 = vmatpush.msra.mxu0 %v65_v20 }
  0x26   :  { %135 = vmatpush.msra.mxu1 %v107_v25  ;;  %173 = vmatpush.msra.mxu2 %v155_v39 }
  0x27   :  { %93 = vmatpush.msra.mxu0 %v64_v22 }
  0x28   :  { %136 = vmatpush.msra.mxu1 %v106_v27  ;;  %174 = vmatpush.msra.mxu2 %v154_v40 }
  0x29   :  { %94 = vmatpush.msra.mxu0 %v63_v24 }
  0x2a   :  { %137 = vmatpush.msra.mxu1 %v105_v30  ;;  %175 = vmatpush.msra.mxu2 %v153_v41 }
  0x2b   :  { %95 = vmatpush.msra.mxu0 %v62_v26 }
  0x2c   :  { %138 = vmatpush.msra.mxu1 %v104_v31  ;;  %176 = vmatpush.msra.mxu2 %v152_v42 }
  0x2d   :  { %96 = vmatpush.msra.mxu0 %v61_v28 }
  0x2e   :  { %97 = vmatmul.f32.vlgmr.msra.gmra.mxu0 %v60_v29  ;;  %139 = vmatpush.msra.mxu1 %v103_v32 }
  0x2f   :  { %177 = vmatpush.msra.mxu2 %v151_v43 }
  0x31   :  { %178 = vmatpush.msra.mxu2 %v150_v44 }
  0x33   :  { %179 = vmatpush.msra.mxu2 %v149_v45 }
  0x35   :  { %180 = vmatpush.msra.mxu2 %v148_v50 }
  0x37   :  { %181 = vmatpush.msra.mxu2 %v147_v51 }
  0x39   :  { %182 = vmatpush.msra.mxu2 %v146_v52 }
  0xab   :  { %v98_v47 = vpop.f32.mrf.mxu0 }
  0xac   :  { %v99_v48 = vadd.f32 %v214_v46, %v98_v47 }
  0xae   :  { %v101_v49 = vmax.f32 %v99_v48, 0.0 }
  0xb0   :  { %140 = vmatmul.f32.vlgmr.msra.gmra.mxu1 %v101_v49 }
 0x12d   :  { %v141_v54 = vpop.f32.mrf.mxu1 }
 0x12e   :  { %v142_v55 = vadd.f32 %v215_v53, %v141_v54 }
 0x130   :  { %v144_v56 = vmax.f32 %v142_v55, 0.0 }
 0x132   :  { %183 = vmatmul.f32.vlgmr.msra.gmra.mxu2 %v144_v56 }
 0x1b5   :  { %v184_v58 = vpop.f32.mrf.mxu2 }
 0x1b6   :  { %v185_v59 = vadd.f32 %v216_v57, %v184_v58 }
 0x1b8   :  { %187 = vst [vmem:[#allocation8] sm:$0xff] %v185_v59 }
 0x1b9   :  { %198 = dma.vmem_to_hbm [thread:$0]  %s194_s2, 128, %s196_s5, [#allocation4]  }
 0x1ba   :  { %317 = dma.done.wait [#allocation4], 128  }
 0x1bb   :  { %318 = vsyncadd [#allocation4], 4294967168 }
 0x1bc   :  { %203 = vsyncpa [#allocation3], 1 }
 0x1bd   :  { %204 = vsyncpa [#allocation6], 1 }
 0x1be   :  { %205 = vsyncpa [#allocation4], 1 }

</bundles_post_ra>
